<compile_context>
chip_gen: v7x
topology: tpu7x:2x2x1
jax: 0.10.0
libtpu: 0.0.40
codegen_flags: <defaults>
</compile_context>

<pallas_src>
import functools

import jax
import jax.numpy as jnp
from jax.experimental import pallas as pl
from jax.experimental.pallas import tpu as pltpu

LANE = 128       # TPU lane width (last dim)
SUBLANE = 8      # TPU sublane count (second-to-last dim)
_VMEM_BUDGET = 12 * 1024 * 1024   # conservative tile budget (fits v5e default scoped VMEM)


def _round_up(n, m):
    return ((n + m - 1) // m) * m


def _cdiv(a, b):
    return -(-a // b)


# ----------------------------- Pallas kernel ------------------------------ #
def _ivp_encoder_kernel(x_ref, y_ref, y0_ref, w1x_ref, w1y_ref, b1_ref,
                        w2_ref, b2_ref, out_ref, *, dy):
    """Fused latent-encoder MLP + z_0 assembly.

    x_ref  : (tm, kx)      flattened x encode window (native dtype)
    y_ref  : (tm, ky)      flattened y encode window (native dtype)
    y0_ref : (tm, Op) f32  y[:, 0, :] pre-placed in lanes [0, dy), zeros after
    w1x/w1y: (kx, H)/(ky, H) bf16  split first-layer weights
    b1_ref : (1, H)  f32
    w2_ref : (H, Op) bf16  second-layer weight placed into columns [dy, dy+L)
    b2_ref : (1, Op) f32   second-layer bias  placed into columns [dy, dy+L)
    out_ref: (tm, Op) f32  z_0 = cat([y0, z_lat], -1), lane-padded to Op
    """
    xb = x_ref[...].astype(w1x_ref.dtype)
    yb = y_ref[...].astype(w1y_ref.dtype)
    # Hidden layer: split-weight MXU matmuls (bf16 operands, f32 accumulate).
    h = jnp.tanh(
        jnp.dot(xb, w1x_ref[...], preferred_element_type=jnp.float32)
        + jnp.dot(yb, w1y_ref[...], preferred_element_type=jnp.float32)
        + b1_ref[...]
    )
    # Output layer; w2/b2 were pre-placed into z_0 columns [dy, dy+L).
    z = jnp.dot(h.astype(w2_ref.dtype), w2_ref[...],
                preferred_element_type=jnp.float32) + b2_ref[...]
    # Fused z_0 = cat([y0, z_lat]): VPU lane-select (bit-exact y0 pass-through),
    # single dense 128-lane store.
    lane = jax.lax.broadcasted_iota(jnp.int32, z.shape, 1)
    out_ref[...] = jnp.where(lane < dy, y0_ref[...], z).astype(out_ref.dtype)


# --------------------------- parameter packing ----------------------------- #
def prepare_params(w1, b1, w2, b2, *, len_encode, dx, dy):
    """Split/permute/pack the torch-layout encoder params for the fused kernel.

    w1: (Din, H) with Din = len_encode*(dx+dy) in the INTERLEAVED layout of
        cat([x, y], dim=-1).reshape(B, -1); b1: (H,); w2: (H, L); b2: (L,).
    Done once, outside the hot path.
    """
    din, hidden = w1.shape
    latent = w2.shape[1]
    assert din == len_encode * (dx + dy)

    kx, ky = len_encode * dx, len_encode * dy
    op = _round_up(dy + latent, LANE)

    # Row split: interleaved-per-timestep layout -> separate x / y row blocks.
    t = jnp.arange(len_encode)
    x_rows = (t[:, None] * (dx + dy) + jnp.arange(dx)[None, :]).reshape(-1)
    y_rows = (t[:, None] * (dx + dy) + dx + jnp.arange(dy)[None, :]).reshape(-1)

    w1x = w1[x_rows].astype(jnp.bfloat16)                    # (kx, H)
    w1y = w1[y_rows].astype(jnp.bfloat16)                    # (ky, H)
    b1r = b1.reshape(1, hidden).astype(jnp.float32)

    # Second layer placed directly into z_0 columns [dy, dy+latent).
    w2p = jnp.zeros((hidden, op), jnp.bfloat16).at[:, dy:dy + latent].set(
        w2.astype(jnp.bfloat16))
    b2p = jnp.zeros((1, op), jnp.float32).at[0, dy:dy + latent].set(
        b2.astype(jnp.float32).reshape(-1))

    return dict(w1x=w1x, w1y=w1y, b1=b1r, w2p=w2p, b2p=b2p,
                kx=kx, ky=ky, op=op, dy=dy, latent=latent, hidden=hidden)


# ------------------------------ module glue -------------------------------- #
def ivp_latent_encode(x, y, prep, *, len_encode):
    """Latent-encoder step of IVPRegressionModelLatEncoder.predict.

    x : (B, S, Dx), y : (B, S, Dy)
    Returns z_0 (B, Dy + L) and z_lat (B, L).
    """
    B = x.shape[0]
    dy = y.shape[-1]
    kx, ky, op = prep["kx"], prep["ky"], prep["op"]
    hidden, latent = prep["hidden"], prep["latent"]

    # Flatten the encode window; keep native dtype (no forced f32 upcast, no
    # concat, no padded activation slab).
    x_flat = x[:, :len_encode, :].reshape(B, kx)
    y_flat = y[:, :len_encode, :].reshape(B, ky)

    # --- VMEM-budget-driven batch tile ------------------------------------ #
    w_bytes_hbm = ((prep["w1x"].size + prep["w1y"].size + prep["w2p"].size) * 2
                   + (prep["b1"].size + prep["b2p"].size) * 4)
    w_bytes_vmem = 2 * w_bytes_hbm                       # default double-buffering
    row_bytes = 2 * (kx + ky + op) * 4 + 2 * op * 4      # dbl-buffered in + out per row (f32 worst case)
    tm_cap = max(SUBLANE,
                 ((_VMEM_BUDGET - w_bytes_vmem) // row_bytes) // SUBLANE * SUBLANE)

    bp8 = _round_up(B, SUBLANE)
    tm = min(bp8, tm_cap)
    # Ensure >=2 grid steps when the batch allows it (keeps both v7x TCs busy;
    # negligible extra pipeline overhead on single-TC v5e/v6e).
    if bp8 >= 2 * SUBLANE and _cdiv(bp8, tm) < 2:
        tm = _round_up(_cdiv(bp8, 2), SUBLANE)
    bp = _round_up(bp8, tm)

    if bp != B:
        pad = ((0, bp - B), (0, 0))
        x_flat = jnp.pad(x_flat, pad)
        y_flat = jnp.pad(y_flat, pad)
    # Tiny lane-dense slab holding y[:, 0, :] in z_0 columns [0, dy).
    y0p = jnp.pad(y[:, 0, :].astype(jnp.float32), ((0, bp - B), (0, op - dy)))

    vmem_need = w_bytes_vmem + tm * row_bytes
    vmem_limit = int(min(max(2 * vmem_need + (2 << 20), 16 << 20), 64 << 20))

    flops = 2 * bp * (kx + ky) * hidden + 2 * bp * hidden * op
    bytes_accessed = (x_flat.size * x_flat.dtype.itemsize
                      + y_flat.size * y_flat.dtype.itemsize
                      + y0p.size * 4 + w_bytes_hbm + bp * op * 4)
    cost = pl.CostEstimate(flops=flops, transcendentals=bp * hidden,
                           bytes_accessed=bytes_accessed)

    kernel = functools.partial(_ivp_encoder_kernel, dy=dy)

    z0_pad = pl.pallas_call(
        kernel,
        out_shape=jax.ShapeDtypeStruct((bp, op), jnp.float32),
        grid_spec=pltpu.PrefetchScalarGridSpec(
            num_scalar_prefetch=0,
            grid=(bp // tm,),
            in_specs=[
                pl.BlockSpec((tm, kx), lambda i: (i, 0)),        # x window (streamed)
                pl.BlockSpec((tm, ky), lambda i: (i, 0)),        # y window (streamed)
                pl.BlockSpec((tm, op), lambda i: (i, 0)),        # y0 placed slab
                pl.BlockSpec((kx, hidden), lambda i: (0, 0)),    # resident weights
                pl.BlockSpec((ky, hidden), lambda i: (0, 0)),
                pl.BlockSpec((1, hidden), lambda i: (0, 0)),
                pl.BlockSpec((hidden, op), lambda i: (0, 0)),
                pl.BlockSpec((1, op), lambda i: (0, 0)),
            ],
            out_specs=pl.BlockSpec((tm, op), lambda i: (i, 0)),
        ),
        compiler_params=pltpu.CompilerParams(
            dimension_semantics=("parallel",),
            vmem_limit_bytes=vmem_limit),
        cost_estimate=cost,
    )(x_flat, y_flat, y0p, prep["w1x"], prep["w1y"], prep["b1"],
      prep["w2p"], prep["b2p"])

    z_0 = z0_pad[:B, :dy + latent]     # single slice of the lane-dense output
    z_lat = z_0[:, dy:]                # derived from z_0 (no second slice of z0_pad)
    return z_0, z_lat


def init_params(key, din, hidden, latent):
    """Deterministic synthetic encoder params in the canonical torch layout."""
    k1, k2, k3, k4 = jax.random.split(key, 4)
    s1 = 1.0 / jnp.sqrt(jnp.float32(din))
    s2 = 1.0 / jnp.sqrt(jnp.float32(hidden))
    return {
        "w1": jax.random.normal(k1, (din, hidden), jnp.float32) * s1,
        "b1": jax.random.normal(k2, (hidden,), jnp.float32) * 0.01,
        "w2": jax.random.normal(k3, (hidden, latent), jnp.float32) * s2,
        "b2": jax.random.normal(k4, (latent,), jnp.float32) * 0.01,
    }


def _reference(x, y, params, len_encode):
    """Pure-JAX f32 reference in the ORIGINAL interleaved layout."""
    B = x.shape[0]
    enc = jnp.concatenate([x[:, :len_encode, :], y[:, :len_encode, :]],
                          axis=-1).reshape(B, -1)
    h = jnp.tanh(enc @ params["w1"] + params["b1"])
    z_lat = h @ params["w2"] + params["b2"]
    z_0 = jnp.concatenate([y[:, 0, :], z_lat], axis=-1)
    return z_0, z_lat


if __name__ == "__main__":
    # Small shapes implied by the module: batched time series (B, S, D).
    B, S, Dx, Dy = 2, 8, 4, 3
    LEN_ENCODE, HIDDEN, LATENT = 4, 32, 16
    DIN = LEN_ENCODE * (Dx + Dy)

    key = jax.random.PRNGKey(0)
    kx_, ky_, kp_, kx2_, ky2_ = jax.random.split(key, 5)
    x = jax.random.normal(kx_, (B, S, Dx), jnp.float32)
    y = jax.random.normal(ky_, (B, S, Dy), jnp.float32)
    params = init_params(kp_, DIN, HIDDEN, LATENT)

    prep = prepare_params(params["w1"], params["b1"], params["w2"], params["b2"],
                          len_encode=LEN_ENCODE, dx=Dx, dy=Dy)

    z_0, z_lat = ivp_latent_encode(x, y, prep, len_encode=LEN_ENCODE)
    jax.block_until_ready((z_0, z_lat))

    z0_ref, zlat_ref = _reference(x, y, params, LEN_ENCODE)
    assert z_0.shape == (B, Dy + LATENT)
    assert z_lat.shape == (B, LATENT)
    # bf16 MXU operands -> compare to the f32 reference with bf16 tolerance.
    assert jnp.allclose(z_lat, zlat_ref, atol=3e-2, rtol=3e-2)
    assert jnp.allclose(z_0, z0_ref, atol=3e-2, rtol=3e-2)
    # y[:, 0, :] is passed through with a VPU lane-select -> bit-exact.
    assert bool(jnp.all(z_0[:, :Dy] == y[:, 0, :]))

    # Second run with a larger batch to exercise the multi-tile (>=2 grid step) path.
    B2 = 20
    x2 = jax.random.normal(kx2_, (B2, S, Dx), jnp.float32)
    y2 = jax.random.normal(ky2_, (B2, S, Dy), jnp.float32)
    z_0b, z_latb = ivp_latent_encode(x2, y2, prep, len_encode=LEN_ENCODE)
    jax.block_until_ready((z_0b, z_latb))
    z0b_ref, zlatb_ref = _reference(x2, y2, params, LEN_ENCODE)
    assert jnp.allclose(z_latb, zlatb_ref, atol=3e-2, rtol=3e-2)
    assert jnp.allclose(z_0b, z0b_ref, atol=3e-2, rtol=3e-2)
    assert bool(jnp.all(z_0b[:, :Dy] == y2[:, 0, :]))

    print("KERNEL_OK")
</pallas_src>

<mosaic_0001>
module attributes {stable_mosaic.version = 11 : i64} {
  func.func @_ivp_encoder_kernel(%arg0: i32, %arg1: memref<8x16xf32, #tpu.memory_space<vmem>>, %arg2: memref<8x12xf32, #tpu.memory_space<vmem>>, %arg3: memref<8x128xf32, #tpu.memory_space<vmem>>, %arg4: memref<16x32xbf16, #tpu.memory_space<vmem>>, %arg5: memref<12x32xbf16, #tpu.memory_space<vmem>>, %arg6: memref<1x32xf32, #tpu.memory_space<vmem>>, %arg7: memref<32x128xbf16, #tpu.memory_space<vmem>>, %arg8: memref<1x128xf32, #tpu.memory_space<vmem>>, %arg9: memref<8x128xf32, #tpu.memory_space<vmem>>) attributes {dimension_semantics = [#tpu.dimension_semantics<parallel>], iteration_bounds = array<i64: 1>, scalar_prefetch = 0 : i64, scratch_operands = 0 : i64, tpu.core_type = #tpu.core_type<tc>, window_params = [{transform_indices = @transform_0, window_bounds = array<i64: 8, 16>}, {transform_indices = @transform_1, window_bounds = array<i64: 8, 12>}, {transform_indices = @transform_2, window_bounds = array<i64: 8, 128>}, {pipeline_mode = #tpu.pipeline_mode<synchronous>, transform_indices = @transform_3, window_bounds = array<i64: 16, 32>}, {pipeline_mode = #tpu.pipeline_mode<synchronous>, transform_indices = @transform_4, window_bounds = array<i64: 12, 32>}, {pipeline_mode = #tpu.pipeline_mode<synchronous>, transform_indices = @transform_5, window_bounds = array<i64: 1, 32>}, {pipeline_mode = #tpu.pipeline_mode<synchronous>, transform_indices = @transform_6, window_bounds = array<i64: 32, 128>}, {pipeline_mode = #tpu.pipeline_mode<synchronous>, transform_indices = @transform_7, window_bounds = array<i64: 1, 128>}, {transform_indices = @transform_8, window_bounds = array<i64: 8, 128>}]} {
    %c0 = arith.constant 0 : index
    %c0_0 = arith.constant 0 : index
    %0 = vector.load %arg1[%c0, %c0_0] : memref<8x16xf32, #tpu.memory_space<vmem>>, vector<8x16xf32>
    %1 = arith.truncf %0 : vector<8x16xf32> to vector<8x16xbf16>
    %c0_1 = arith.constant 0 : index
    %c0_2 = arith.constant 0 : index
    %2 = vector.load %arg2[%c0_1, %c0_2] : memref<8x12xf32, #tpu.memory_space<vmem>>, vector<8x12xf32>
    %3 = arith.truncf %2 : vector<8x12xf32> to vector<8x12xbf16>
    %c0_3 = arith.constant 0 : index
    %c0_4 = arith.constant 0 : index
    %4 = vector.load %arg4[%c0_3, %c0_4] : memref<16x32xbf16, #tpu.memory_space<vmem>>, vector<16x32xbf16>
    %cst = arith.constant dense<0.000000e+00> : vector<8x32xf32>
    %5 = tpu.matmul %1, %4, %cst {dimension_numbers = #tpu.dot_dimension_numbers<[1], [0], [0], [1], [0, 0, 1, 1], [], []>} : vector<8x16xbf16>, vector<16x32xbf16>, vector<8x32xf32> -> vector<8x32xf32>
    %c0_5 = arith.constant 0 : index
    %c0_6 = arith.constant 0 : index
    %6 = vector.load %arg5[%c0_5, %c0_6] : memref<12x32xbf16, #tpu.memory_space<vmem>>, vector<12x32xbf16>
    %cst_7 = arith.constant dense<0.000000e+00> : vector<8x32xf32>
    %7 = tpu.matmul %3, %6, %cst_7 {dimension_numbers = #tpu.dot_dimension_numbers<[1], [0], [0], [1], [0, 0, 1, 1], [], []>} : vector<8x12xbf16>, vector<12x32xbf16>, vector<8x32xf32> -> vector<8x32xf32>
    %8 = arith.addf %5, %7 : vector<8x32xf32>
    %c0_8 = arith.constant 0 : index
    %c0_9 = arith.constant 0 : index
    %9 = vector.load %arg6[%c0_8, %c0_9] : memref<1x32xf32, #tpu.memory_space<vmem>>, vector<1x32xf32>
    %10 = vector.broadcast %9 : vector<1x32xf32> to vector<8x32xf32>
    %11 = arith.addf %8, %10 : vector<8x32xf32>
    %12 = math.tanh %11 : vector<8x32xf32>
    %13 = arith.truncf %12 : vector<8x32xf32> to vector<8x32xbf16>
    %c0_10 = arith.constant 0 : index
    %c0_11 = arith.constant 0 : index
    %14 = vector.load %arg7[%c0_10, %c0_11] : memref<32x128xbf16, #tpu.memory_space<vmem>>, vector<32x128xbf16>
    %cst_12 = arith.constant dense<0.000000e+00> : vector<8x128xf32>
    %15 = tpu.matmul %13, %14, %cst_12 {dimension_numbers = #tpu.dot_dimension_numbers<[1], [0], [0], [1], [0, 0, 1, 1], [], []>} : vector<8x32xbf16>, vector<32x128xbf16>, vector<8x128xf32> -> vector<8x128xf32>
    %c0_13 = arith.constant 0 : index
    %c0_14 = arith.constant 0 : index
    %16 = vector.load %arg8[%c0_13, %c0_14] : memref<1x128xf32, #tpu.memory_space<vmem>>, vector<1x128xf32>
    %17 = vector.broadcast %16 : vector<1x128xf32> to vector<8x128xf32>
    %18 = arith.addf %15, %17 : vector<8x128xf32>
    %19 = tpu.iota {dimensions = array<i32: 1>} : vector<8x128xi32>
    %c3_i32 = arith.constant 3 : i32
    %20 = vector.broadcast %c3_i32 : i32 to vector<8x128xi32>
    %21 = arith.cmpi slt, %19, %20 : vector<8x128xi32>
    %c0_15 = arith.constant 0 : index
    %c0_16 = arith.constant 0 : index
    %22 = vector.load %arg3[%c0_15, %c0_16] : memref<8x128xf32, #tpu.memory_space<vmem>>, vector<8x128xf32>
    %23 = arith.select %21, %22, %18 : vector<8x128xi1>, vector<8x128xf32>
    %c0_17 = arith.constant 0 : index
    %c0_18 = arith.constant 0 : index
    %24 = vector.load %arg9[%c0_17, %c0_18] : memref<8x128xf32, #tpu.memory_space<vmem>>, vector<8x128xf32>
    tpu.vector_store %arg9[%c0_17, %c0_18], %23 {strides = array<i32>} : memref<8x128xf32, #tpu.memory_space<vmem>>, vector<8x128xf32>,
    return
  }
  func.func @transform_0(%arg0: i32) -> (i32, i32) {
    %c0_i32 = arith.constant 0 : i32
    %c0_i32_0 = arith.constant 0 : i32
    return %arg0, %c0_i32 : i32, i32
  }
  func.func @transform_1(%arg0: i32) -> (i32, i32) {
    %c0_i32 = arith.constant 0 : i32
    %c0_i32_0 = arith.constant 0 : i32
    return %arg0, %c0_i32 : i32, i32
  }
  func.func @transform_2(%arg0: i32) -> (i32, i32) {
    %c0_i32 = arith.constant 0 : i32
    %c0_i32_0 = arith.constant 0 : i32
    return %arg0, %c0_i32 : i32, i32
  }
  func.func @transform_3(%arg0: i32) -> (i32, i32) {
    %c0_i32 = arith.constant 0 : i32
    %c0_i32_0 = arith.constant 0 : i32
    %c0_i32_1 = arith.constant 0 : i32
    return %c0_i32, %c0_i32_0 : i32, i32
  }
  func.func @transform_4(%arg0: i32) -> (i32, i32) {
    %c0_i32 = arith.constant 0 : i32
    %c0_i32_0 = arith.constant 0 : i32
    %c0_i32_1 = arith.constant 0 : i32
    return %c0_i32, %c0_i32_0 : i32, i32
  }
  func.func @transform_5(%arg0: i32) -> (i32, i32) {
    %c0_i32 = arith.constant 0 : i32
    %c0_i32_0 = arith.constant 0 : i32
    %c0_i32_1 = arith.constant 0 : i32
    return %c0_i32, %c0_i32_0 : i32, i32
  }
  func.func @transform_6(%arg0: i32) -> (i32, i32) {
    %c0_i32 = arith.constant 0 : i32
    %c0_i32_0 = arith.constant 0 : i32
    %c0_i32_1 = arith.constant 0 : i32
    return %c0_i32, %c0_i32_0 : i32, i32
  }
  func.func @transform_7(%arg0: i32) -> (i32, i32) {
    %c0_i32 = arith.constant 0 : i32
    %c0_i32_0 = arith.constant 0 : i32
    %c0_i32_1 = arith.constant 0 : i32
    return %c0_i32, %c0_i32_0 : i32, i32
  }
  func.func @transform_8(%arg0: i32) -> (i32, i32) {
    %c0_i32 = arith.constant 0 : i32
    %c0_i32_0 = arith.constant 0 : i32
    return %arg0, %c0_i32 : i32, i32
  }
}

</mosaic_0001>

<bundles_post_ra>
// kernel: tpu_custom_call.1
= control target key start
LH: loop header
LB: loop body
LE: loop exit
PB: predicated region body
PF: predicated region fallthrough
CT: control target
= control target key end

     0   :  { %13 = vsyncpa [#allocation3], 0  ;;  %s651_s0 = inlined_call_operand.hbm [shape: f32[8,16], index: 0, kind: input, shape index: {}]   ;;  %s652_s1 = inlined_call_operand.hbm [shape: f32[8,12], index: 1, kind: input, shape index: {}]   ;;  %s653_s2 = inlined_call_operand.hbm [shape: f32[8,128], index: 2, kind: input, shape index: {}]   ;;  %s654_s3 = inlined_call_operand.hbm [shape: bf16[16,32], index: 3, kind: input, shape index: {}]   ;;  %s655_s4 = inlined_call_operand.hbm [shape: bf16[12,32], index: 4, kind: input, shape index: {}]   ;;  %s656_s5 = inlined_call_operand.vmem [shape: f32[1,32], index: 5, kind: input, shape index: {}]   ;;  %s657_s6 = inlined_call_operand.vmem [shape: bf16[32,128], index: 6, kind: input, shape index: {}]   ;;  %s658_s7 = inlined_call_operand.vmem [shape: f32[1,128], index: 7, kind: input, shape index: {}]   ;;  %s659_s8 = inlined_call_operand.hbm [shape: f32[8,128], index: 8, kind: output, shape index: {}]  }
   0x1   :  { %14 = vsyncpa [#allocation6], 0 }
   0x2   :  { %15 = vsyncpa [#allocation9], 0 }
   0x3   :  { %16 = vsyncpa [#allocation4], 0  ;;  %s496_s27 = smov [#allocation5]   ;;  %s497_s29 = smov [#allocation8]  }
   0x4   :  { %s33_s28 = sshll.u32 %s496_s27, 4  ;;  %s52_s30 = sshll.u32 %s497_s29, 4  ;;  %s34_s28 = int_to_ptr.vmem [resolvable:$true] %s33_s28  ;;  %s551_s30 = int_to_ptr.vmem [resolvable:$true] %s52_s30 }
   0x5   :  { %s356_s11 = scalar_lea.hbm %s652_s1, 128 }
   0x6   :  { %p357_p0 = scmp.ne.s32.totalorder %s652_s1, %s356_s11  ;;  %p360_p1 = scmp.lt.u32.totalorder %s356_s11, %s652_s1 }
   0x8   :  { %p362_p2 = pnand %p360_p1, %p357_p0 }
   0xa   :  { %365 = shalt.err (!%p362_p2)
}
   0xb   :  { %s366_s16 = scalar_lea.vmem %s34_s28, 128  ;;  %p371_p4 = scmp.lt.s32.totalorder %s34_s28, %s34_s28 }
   0xc   :  { %p367_p3 = scmp.ne.s32.totalorder %s34_s28, %s366_s16  ;;  %p372_p5 = scmp.lt.s32.totalorder %s366_s16, %s366_s16 }
   0xe   :  { %p373_p6 = por %p372_p5, %p371_p4 }
  0x10   :  { %p374_p7 = pnand %p373_p6, %p367_p3 }
  0x12   :  { %377 = shalt.err (!%p374_p7)
}
  0x13   :  { %36 = dma.hbm_to_vmem [thread:$0]  %s652_s1, 128, %s34_s28, [#allocation6]  }
  0x14   :  { %s378_s21 = scalar_lea.hbm %s654_s3, 128 }
  0x15   :  { %p379_p8 = scmp.ne.s32.totalorder %s654_s3, %s378_s21  ;;  %p382_p9 = scmp.lt.u32.totalorder %s378_s21, %s654_s3 }
  0x17   :  { %p384_p10 = pnand %p382_p9, %p379_p8 }
  0x19   :  { %387 = shalt.err (!%p384_p10)
}
  0x1a   :  { %s388_s26 = scalar_lea.vmem %s551_s30, 128  ;;  %p393_p12 = scmp.lt.s32.totalorder %s551_s30, %s551_s30 }
  0x1b   :  { %p389_p11 = scmp.ne.s32.totalorder %s551_s30, %s388_s26  ;;  %p394_p13 = scmp.lt.s32.totalorder %s388_s26, %s388_s26 }
  0x1d   :  { %p395_p0 = por %p394_p13, %p393_p12 }
  0x1f   :  { %p396_p1 = pnand %p395_p0, %p389_p11 }
  0x21   :  { %399 = shalt.err (!%p396_p1)
}
  0x22   :  { %s498_s1 = smov 64   ;;  %s499_s27 = smov 4  }
  0x23   :  { %58 = dma.hbm_to_vmem [thread:$0]  %s654_s3, 128, %s551_s30, [#allocation9], %s498_s1, %s498_s1, %s499_s27  }
  0x24   :  { %s500_s9 = smov [#allocation2]   ;;  %s501_s11 = smov [#allocation7]  }
  0x25   :  { %s23_s10 = sshll.u32 %s500_s9, 4  ;;  %s43_s12 = sshll.u32 %s501_s11, 4  ;;  %s24_s10 = int_to_ptr.vmem [resolvable:$true] %s23_s10  ;;  %s44_s12 = int_to_ptr.vmem [resolvable:$true] %s43_s12 }
  0x26   :  { %s400_s15 = scalar_lea.hbm %s651_s0, 128 }
  0x27   :  { %p401_p2 = scmp.ne.s32.totalorder %s651_s0, %s400_s15  ;;  %p404_p3 = scmp.lt.u32.totalorder %s400_s15, %s651_s0 }
  0x29   :  { %p406_p4 = pnand %p404_p3, %p401_p2 }
  0x2b   :  { %409 = shalt.err (!%p406_p4)
}
  0x2c   :  { %s410_s3 = scalar_lea.vmem %s24_s10, 128  ;;  %p415_p6 = scmp.lt.s32.totalorder %s24_s10, %s24_s10 }
  0x2d   :  { %p411_p5 = scmp.ne.s32.totalorder %s24_s10, %s410_s3  ;;  %p416_p7 = scmp.lt.s32.totalorder %s410_s3, %s410_s3 }
  0x2f   :  { %p417_p8 = por %p416_p7, %p415_p6 }
  0x31   :  { %p418_p9 = pnand %p417_p8, %p411_p5 }
  0x33   :  { %421 = shalt.err (!%p418_p9)
}
  0x34   :  { %26 = dma.hbm_to_vmem [thread:$0]  %s651_s0, 128, %s24_s10, [#allocation3]  }
  0x35   :  { %s422_s23 = scalar_lea.hbm %s653_s2, 128 }
  0x36   :  { %p423_p10 = scmp.ne.s32.totalorder %s653_s2, %s422_s23  ;;  %p426_p11 = scmp.lt.u32.totalorder %s422_s23, %s653_s2 }
  0x38   :  { %p428_p12 = pnand %p426_p11, %p423_p10 }
  0x3a   :  { %431 = shalt.err (!%p428_p12)
}
  0x3b   :  { %s432_s29 = scalar_lea.vmem %s44_s12, 128  ;;  %p437_p0 = scmp.lt.s32.totalorder %s44_s12, %s44_s12 }
  0x3c   :  { %p433_p13 = scmp.ne.s32.totalorder %s44_s12, %s432_s29  ;;  %p438_p1 = scmp.lt.s32.totalorder %s432_s29, %s432_s29 }
  0x3e   :  { %p439_p2 = por %p438_p1, %p437_p0 }
  0x40   :  { %p440_p3 = pnand %p439_p2, %p433_p13 }
  0x42   :  { %443 = shalt.err (!%p440_p3)
}
  0x43   :  { %46 = dma.hbm_to_vmem [thread:$0]  %s653_s2, 128, %s44_s12, [#allocation6]  }
  0x44   :  { %s502_s10 = smov [#allocation10]   ;;  %s444_s15 = scalar_lea.hbm %s655_s4, 128 }
  0x45   :  { %s64_s11 = sshll.u32 %s502_s10, 4  ;;  %p445_p4 = scmp.ne.s32.totalorder %s655_s4, %s444_s15  ;;  %s65_s11 = int_to_ptr.vmem [resolvable:$true] %s64_s11 }
  0x46   :  { %p448_p5 = scmp.lt.u32.totalorder %s444_s15, %s655_s4 }
  0x48   :  { %p450_p6 = pnand %p448_p5, %p445_p4 }
  0x4a   :  { %453 = shalt.err (!%p450_p6)
}
  0x4b   :  { %s454_s3 = scalar_lea.vmem %s65_s11, 128  ;;  %p459_p8 = scmp.lt.s32.totalorder %s65_s11, %s65_s11 }
  0x4c   :  { %p455_p7 = scmp.ne.s32.totalorder %s65_s11, %s454_s3  ;;  %p460_p9 = scmp.lt.s32.totalorder %s454_s3, %s454_s3 }
  0x4e   :  { %p461_p10 = por %p460_p9, %p459_p8 }
  0x50   :  { %p462_p11 = pnand %p461_p10, %p455_p7 }
  0x52   :  { %465 = shalt.err (!%p462_p11)
}
  0x53   :  { %70 = dma.hbm_to_vmem [thread:$0]  %s655_s4, 128, %s65_s11, [#allocation9], %s498_s1, %s498_s1, %s499_s27  }
  0x54   :  { %488 = dma.done.wait [#allocation3], 128  }
  0x55   :  { %489 = vsyncadd [#allocation3], 4294967168 }
  0x56   :  { %490 = dma.done.wait [#allocation6], 256  }
  0x57   :  { %491 = vsyncadd [#allocation6], 4294967040 }
  0x58   :  { %492 = dma.done.wait [#allocation9], 256  }
  0x59   :  { %493 = vsyncadd [#allocation9], 4294967040  ;;  %v503_v0 = vmov 0.0   ;;  %vm504_vm0 = vmmov 0   ;;  %v350_v1 = vld [vmem:[#allocation8] sm:$0xff]   ;;  %vm110_vm1 = vcmask 1045504   ;;  %v281_v23 = vlaneseq }
  0x5a   :  { %326 = vmatprep.subr.bf16.mxu1 %v503_v0  ;;  %320 = vmatprep.subr.bf16.mxu0 %v503_v0  ;;  %v351_v2 = vld [vmem:[#allocation10] sm:$0x3f]   ;;  %vm160_vm2 = vcmask 130048   ;;  %v95_v4 = vld [vmem:[#allocation5] sm:$0xff]  ;;  %vm106_vm3 = vcmask 97280   ;;  %v352_v8 = vld [vmem:[%s657_s6] sm:$0xff]  }
  0x5b   :  { %328 = vmatprep.mubr.msk.bf16.mxu1 %vm504_vm0, %v503_v0  ;;  %322 = vmatprep.mubr.msk.bf16.mxu0 %vm504_vm0, %v503_v0  ;;  %v93_v3 = vld [vmem:[#allocation2] sm:$0xff]  ;;  %v112_v5 = vsel %vm110_vm1, %v351_v2, 0  ;;  %v96_v7 = vpack.c.bf16 %v95_v4, %v95_v4  ;;  %v353_v9 = vld [vmem:[%s657_s6 + $0x8] sm:$0xff]   ;;  %v308_v13 = vld [vmem:[%s656_s5] ss:$0 sm:$0xff]  ;;  %vm237_vm4 = vcmask 261120  }
  0x5c   :  { %327 = vmatpush3.bf16.msra.mxu1 %v350_v1  ;;  %v94_v6 = vpack.c.bf16 %v93_v3, %v93_v3  ;;  %321 = vmatpush3.bf16.msra.mxu0 %v112_v5  ;;  %v282_v24 = vand.u32 127, %v281_v23  ;;  %v309_v25 = vld [vmem:[%s658_s7] ss:$0 sm:$0xff]  ;;  %s505_s23 = smov [#allocation11]  }
  0x5d   :  { %332 = vmatprep.subr.bf16.mxu0 %v503_v0  ;;  %s293_s5 = sshll.u32 %s505_s23, 4  ;;  %v284_v27 = vld [vmem:[#allocation7] sm:$0xff]  ;;  %s294_s5 = int_to_ptr.vmem [resolvable:$true] %s293_s5 }
  0x5e   :  { %vm283_vm5 = vcmp.lt.s32.totalorder %v282_v24, 3  ;;  %s466_s24 = scalar_lea.vmem %s294_s5, 128  ;;  %p471_p13 = scmp.lt.s32.totalorder %s294_s5, %s294_s5 }
  0x5f   :  { %329 = vmatmul.mubr.msk.bf16.vlgmr.msra.gmra.mrb[0].mxu1 %vm160_vm2, %v94_v6  ;;  %323 = vmatmul.mubr.msk.bf16.vlgmr.msra.gmra.mrb[0].mxu0 %vm106_vm3, %v96_v7  ;;  %p467_p12 = scmp.ne.s32.totalorder %s294_s5, %s466_s24  ;;  %p472_p0 = scmp.lt.s32.totalorder %s466_s24, %s466_s24 }
  0x60   :  { %336 = vmatprep.mubr.msk.bf16.mxu0 %vm504_vm0, %v503_v0  ;;  %333 = vmatpush3.bf16.msra.mxu0 %v352_v8 }
  0x61   :  { %334 = vmatprep.subr.bf16.mxu0 %v503_v0  ;;  %p473_p1 = por %p472_p0, %p471_p13 }
  0x63   :  { %p474_p2 = pnand %p473_p1, %p467_p12 }
  0x64   :  { %335 = vmatpush3.bf16.msra.mxu0 %v353_v9 }
 0x132   :  { %v198_v10 = vpop.f32.mrb[0].mxu1  ;;  %v148_v12 = vpop.f32.mrb[0].mxu0 }
 0x133   :  { %v330_v11 = vpop.f32.mrb[1].mxu1  ;;  %v199_v15 = vadd.f32 %v198_v10, %v148_v12  ;;  %v324_v16 = vpop.f32.mrb[1].mxu0 }
 0x134   :  { %v201_v14 = vpop.f32.mrb[2].mxu1  ;;  %v151_v18 = vpop.f32.mrb[2].mxu0 }
 0x135   :  { %v331_v17 = vpop.f32.mrb[3].mxu1  ;;  %v211_v19 = vadd.f32 %v308_v13, %v199_v15  ;;  %v325_v20 = vpop.f32.mrb[3].mxu0 }
 0x137   :  { %354 = vtanh.f32 %v211_v19 }
 0x141   :  { %v355_v21 = vpop.eup %354 }
 0x142   :  { %v213_v22 = vpack.c.bf16 %v355_v21, %v355_v21 }
 0x144   :  { %337 = vmatmul.mubr.msk.bf16.vlgmr.msra.gmra.mrb[4].mxu0 %vm237_vm4, %v213_v22 }
 0x217   :  { %v275_v26 = vpop.f32.mrb[4].mxu0 }
 0x218   :  { %v276_v28 = vadd.f32 %v309_v25, %v275_v26  ;;  %v338_v29 = vpop.f32.mrb[5].mxu0 }
 0x219   :  { %v278_v30 = vpop.f32.mrb[6].mxu0 }
 0x21a   :  { %v339_v31 = vpop.f32.mrb[7].mxu0  ;;  %v285_v32 = vsel %vm283_vm5, %v284_v27, %v276_v28 }
 0x21b   :  { %286 = vst [vmem:[#allocation11] sm:$0xff] %v285_v32 }
 0x21c   :  { %477 = shalt.err (!%p474_p2)
}
 0x21d   :  { %s478_s26 = scalar_lea.hbm %s659_s8, 128 }
 0x21e   :  { %p479_p3 = scmp.ne.s32.totalorder %s659_s8, %s478_s26  ;;  %p482_p4 = scmp.lt.u32.totalorder %s478_s26, %s659_s8 }
 0x220   :  { %p484_p5 = pnand %p482_p4, %p479_p3 }
 0x222   :  { %487 = shalt.err (!%p484_p5)
}
 0x223   :  { %296 = dma.vmem_to_hbm [thread:$0]  %s294_s5, 128, %s659_s8, [#allocation4]  }
 0x224   :  { %494 = dma.done.wait [#allocation4], 128  }
 0x225   :  { %495 = vsyncadd [#allocation4], 4294967168 }
 0x226   :  { %300 = vsyncpa [#allocation3], 1 }
 0x227   :  { %301 = vsyncpa [#allocation6], 1 }
 0x228   :  { %302 = vsyncpa [#allocation9], 1 }
 0x229   :  { %303 = vsyncpa [#allocation4], 1 }

</bundles_post_ra>
